<compile_context>
chip_gen: v5e
topology: v5e:2x2
jax: 0.10.0
libtpu: 0.0.40
codegen_flags: <defaults>
</compile_context>

<pallas_src>
import functools

import jax
import jax.numpy as jnp
from jax import lax
from jax.experimental import pallas as pl
from jax.experimental.pallas import tpu as pltpu


def _round_up(x, m):
    return ((x + m - 1) // m) * m


def _tile_and_pad(dim, pref, align):
    """Pick a tile size and padded extent for one matmul dimension."""
    if dim >= pref:
        return pref, _round_up(dim, pref)
    padded = _round_up(dim, align)
    return padded, padded


def _pad2d(a, rows, cols):
    r, c = a.shape
    if r == rows and c == cols:
        return a
    return jnp.pad(a, ((0, rows - r), (0, cols - c)))


# ----------------------------------------------------------------------------
# Kernel 1: encoder "patchify" conv as a tiled MXU matmul (im2col in glue JAX)
# ----------------------------------------------------------------------------
def _patch_matmul_kernel(p_ref, w_ref, b_ref, o_ref, acc_ref):
    @pl.when(pl.program_id(2) == 0)
    def _init():
        acc_ref[...] = jnp.zeros_like(acc_ref)

    acc_ref[...] += jnp.dot(p_ref[...], w_ref[...],
                            preferred_element_type=jnp.float32)

    @pl.when(pl.program_id(2) == pl.num_programs(2) - 1)
    def _finalize():
        o_ref[...] = jnp.maximum(acc_ref[...] + b_ref[...], 0.0)  # bias + ReLU


def encoder_patchify(x, w_enc, b_enc, ds):
    """x: (B, C_in, H, W) f32 -> (B, Hp, Wp, C_feat) f32 (channels-last)."""
    B, C_in, H, W = x.shape
    C_feat = w_enc.shape[0]
    Hp, Wp = H // ds, W // ds
    N = B * Hp * Wp
    P = C_in * ds * ds

    # im2col (glue) done in bf16 to halve the HBM round-trip of the transpose.
    # TODO(synk): fold the patch gather into the Pallas pipeline (index_map
    #             over (B, Hp, Wp) blocks of raw NCHW) to avoid the im2col
    #             materialization entirely.
    xb = x.astype(jnp.bfloat16)
    patches = xb.reshape(B, C_in, Hp, ds, Wp, ds)
    patches = patches.transpose(0, 2, 4, 1, 3, 5).reshape(N, P)

    w_mat = w_enc.reshape(C_feat, P).T          # (P, C_feat)
    b_mat = b_enc.reshape(1, C_feat)

    # MXU-friendly tiles; pad every dim to 128-multiples (zeros are free).
    TM, M_pad = _tile_and_pad(N, 256, 16)
    TK, P_pad = _tile_and_pad(P, 512, 128)
    TN, C_pad = _tile_and_pad(C_feat, 256, 128)

    patches_p = _pad2d(patches, M_pad, P_pad)                       # bf16
    w_pad = _pad2d(w_mat, P_pad, C_pad).astype(jnp.bfloat16)        # bf16
    b_pad = _pad2d(b_mat, 1, C_pad)                                 # f32

    grid = (M_pad // TM, C_pad // TN, P_pad // TK)
    out = pl.pallas_call(
        _patch_matmul_kernel,
        out_shape=jax.ShapeDtypeStruct((M_pad, C_pad), jnp.float32),
        grid=grid,
        in_specs=[
            pl.BlockSpec((TM, TK), lambda i, j, k: (i, k)),
            pl.BlockSpec((TK, TN), lambda i, j, k: (k, j)),
            pl.BlockSpec((1, TN), lambda i, j, k: (0, j)),
        ],
        out_specs=pl.BlockSpec((TM, TN), lambda i, j, k: (i, j)),
        scratch_shapes=[pltpu.VMEM((TM, TN), jnp.float32)],
        compiler_params=pltpu.CompilerParams(
            dimension_semantics=("parallel", "parallel", "arbitrary"),
            vmem_limit_bytes=48 * 1024 * 1024),
    )(patches_p, w_pad, b_pad)

    return out[:N, :C_feat].reshape(B, Hp, Wp, C_feat)


# ----------------------------------------------------------------------------
# Kernel 2: SED head (mean over freq, pool3 max+avg, fc1+ReLU, AttBlockV2)
# ----------------------------------------------------------------------------
def _sed_head_kernel(enc_ref, w1t_ref, b1_ref, wac_ref, bac_ref,
                     seg_ref, cla_ref, clip_ref, logit_ref):
    enc = enc_ref[0]                       # (Hp, T, C) f32
    # torch.mean(x, dim=2): average over the frequency axis.
    x = jnp.mean(enc, axis=0)              # (T, C) f32
    C = x.shape[1]

    # max_pool1d(k=3,s=1,p=1) + avg_pool1d(k=3,s=1,p=1) along time.
    # max pool pads with -inf; avg pool pads with 0 and divides by 3
    # (count_include_pad=True, PyTorch default).
    neg_inf_row = jnp.full((1, C), -jnp.inf, jnp.float32)
    zero_row = jnp.zeros((1, C), jnp.float32)
    prev_m = jnp.concatenate([neg_inf_row, x[:-1, :]], axis=0)   # x[t-1]
    next_m = jnp.concatenate([x[1:, :], neg_inf_row], axis=0)    # x[t+1]
    x1 = jnp.maximum(jnp.maximum(prev_m, x), next_m)
    prev_a = jnp.concatenate([zero_row, x[:-1, :]], axis=0)
    next_a = jnp.concatenate([x[1:, :], zero_row], axis=0)
    x2 = (prev_a + x + next_a) * jnp.float32(1.0 / 3.0)
    x = x1 + x2
    # dropout(p=0.5) is identity in eval mode.

    # fc1 + ReLU: bf16 MXU operands, f32 accumulation & elementwise math.
    h = jnp.dot(x.astype(jnp.bfloat16), w1t_ref[...],
                preferred_element_type=jnp.float32) + b1_ref[...]
    h = jnp.maximum(h, 0.0)
    # second dropout is identity in eval mode.

    # AttBlockV2: att & cla 1x1 Conv1d fused into one lane-dense matmul.
    ac = jnp.dot(h.astype(jnp.bfloat16), wac_ref[...],
                 preferred_element_type=jnp.float32) + bac_ref[...]
    kp = ac.shape[1] // 2
    att_logit = ac[:, :kp]                 # (T, Kp)
    cla_logit = ac[:, kp:]                 # (T, Kp)

    # softmax(tanh(att), over time) — time is axis 0 in this layout.
    att = jnp.tanh(att_logit)
    att_max = jnp.max(att, axis=0, keepdims=True)
    e = jnp.exp(att - att_max)
    norm_att = e * pl.reciprocal(jnp.sum(e, axis=0, keepdims=True), approx=True)

    seg = jax.nn.sigmoid(cla_logit)        # (T, Kp)

    seg_ref[0] = seg
    cla_ref[0] = cla_logit
    clip_ref[0] = jnp.sum(norm_att * seg, axis=0, keepdims=True)        # (1, Kp)
    logit_ref[0] = jnp.sum(norm_att * cla_logit, axis=0, keepdims=True)  # (1, Kp)


def sed_head(enc, w1, b1, w_att, b_att, w_cla, b_cla):
    """enc: (B, Hp, T, C) -> (seg (B,T,K), cla_logit (B,T,K), clip (B,K), logit (B,K))."""
    B, Hp, T, C = enc.shape
    K = w_att.shape[0]
    Kp = _round_up(K, 128)                 # lane-dense class dimension

    w1t = w1.T.astype(jnp.bfloat16)        # (C, C) bf16, resident weight
    b1_m = b1.reshape(1, C)                # f32

    watt_t = _pad2d(w_att.reshape(K, C).T, C, Kp)
    wcla_t = _pad2d(w_cla.reshape(K, C).T, C, Kp)
    wac = jnp.concatenate([watt_t, wcla_t], axis=1).astype(jnp.bfloat16)  # (C, 2Kp)
    bac = jnp.concatenate([_pad2d(b_att.reshape(1, K), 1, Kp),
                           _pad2d(b_cla.reshape(1, K), 1, Kp)], axis=1)   # (1, 2Kp)

    out_shapes = (
        jax.ShapeDtypeStruct((B, T, Kp), jnp.float32),   # segmentwise (sigmoid)
        jax.ShapeDtypeStruct((B, T, Kp), jnp.float32),   # cla logits
        jax.ShapeDtypeStruct((B, 1, Kp), jnp.float32),   # clipwise
        jax.ShapeDtypeStruct((B, 1, Kp), jnp.float32),   # logit
    )
    seg, cla_logit, clip, logit = pl.pallas_call(
        _sed_head_kernel,
        out_shape=out_shapes,
        grid=(B,),
        in_specs=[
            pl.BlockSpec((1, Hp, T, C), lambda b: (b, 0, 0, 0)),
            pl.BlockSpec((C, C), lambda b: (0, 0)),
            pl.BlockSpec((1, C), lambda b: (0, 0)),
            pl.BlockSpec((C, 2 * Kp), lambda b: (0, 0)),
            pl.BlockSpec((1, 2 * Kp), lambda b: (0, 0)),
        ],
        out_specs=[
            pl.BlockSpec((1, T, Kp), lambda b: (b, 0, 0)),
            pl.BlockSpec((1, T, Kp), lambda b: (b, 0, 0)),
            pl.BlockSpec((1, 1, Kp), lambda b: (b, 0, 0)),
            pl.BlockSpec((1, 1, Kp), lambda b: (b, 0, 0)),
        ],
        compiler_params=pltpu.CompilerParams(
            dimension_semantics=("parallel",),
            vmem_limit_bytes=48 * 1024 * 1024),
    )(enc, w1t, b1_m, wac, bac)

    return (seg[:, :, :K], cla_logit[:, :, :K],
            clip[:, 0, :K], logit[:, 0, :K])


# ----------------------------------------------------------------------------
# Glue: interpolate (frame repeat) + pad_framewise_output
# ----------------------------------------------------------------------------
def _interpolate(x, ratio):
    # x: (B, T, K) -> (B, T*ratio, K), each frame repeated `ratio` times.
    return jnp.repeat(x, ratio, axis=1)


def _pad_framewise_output(x, frames_num):
    pad_len = frames_num - x.shape[1]
    if pad_len <= 0:
        return x
    last = jnp.repeat(x[:, -1:, :], pad_len, axis=1)
    return jnp.concatenate([x, last], axis=1)


# ----------------------------------------------------------------------------
# Full model wrapper
# ----------------------------------------------------------------------------
@functools.partial(jax.jit, static_argnames=("ds",))
def resnest_sed_forward(x, params, ds):
    frames_num = x.shape[3]
    enc = encoder_patchify(x, params["w_enc"], params["b_enc"], ds)  # (B,Hp,T,C)
    seg, cla_logit, clipwise, logit = sed_head(
        enc, params["w_fc1"], params["b_fc1"],
        params["w_att"], params["b_att"],
        params["w_cla"], params["b_cla"])

    segmentwise_output = seg          # (B, T, K) == torch transpose(1, 2)
    segmentwise_logit = cla_logit     # (B, T, K)

    ratio = frames_num // segmentwise_output.shape[1]
    framewise_output = _pad_framewise_output(
        _interpolate(segmentwise_output, ratio), frames_num)
    framewise_logit = _pad_framewise_output(
        _interpolate(segmentwise_logit, ratio), frames_num)

    return {
        "framewise_output": framewise_output,
        "segmentwise_output": segmentwise_output,
        "logit": logit,
        "framewise_logit": framewise_logit,
        "clipwise_output": clipwise,
    }


def init_params(key, c_in, c_feat, num_classes, ds):
    ks = jax.random.split(key, 8)

    def xavier(k, shape, fan_in, fan_out):
        lim = (6.0 / (fan_in + fan_out)) ** 0.5
        return jax.random.uniform(k, shape, jnp.float32, -lim, lim)

    p_dim = c_in * ds * ds
    return {
        # encoder stand-in: conv weight (C_feat, C_in, ds, ds), bias (C_feat,)
        "w_enc": xavier(ks[0], (c_feat, c_in, ds, ds), p_dim, c_feat),
        "b_enc": jnp.zeros((c_feat,), jnp.float32),
        # fc1: Linear(in_features, in_features)  (init_layer: xavier, bias=0)
        "w_fc1": xavier(ks[1], (c_feat, c_feat), c_feat, c_feat),
        "b_fc1": jnp.zeros((c_feat,), jnp.float32),
        # AttBlockV2: att / cla are Conv1d(in_features, num_classes, k=1)
        "w_att": xavier(ks[2], (num_classes, c_feat, 1), c_feat, num_classes),
        "b_att": jnp.zeros((num_classes,), jnp.float32),
        "w_cla": xavier(ks[3], (num_classes, c_feat, 1), c_feat, num_classes),
        "b_cla": jnp.zeros((num_classes,), jnp.float32),
    }


if __name__ == "__main__":
    key = jax.random.PRNGKey(0)
    k_x, k_p = jax.random.split(key)

    B, C_IN, H, W = 2, 3, 16, 64      # (batch, channels, mel bins, frames)
    C_FEAT = 32                       # stand-in for ResNeSt in_features (2048)
    NUM_CLASSES = 24                  # stand-in for 264
    DS = 8                            # encoder downsample factor stand-in

    x = jax.random.normal(k_x, (B, C_IN, H, W), jnp.float32)
    params = init_params(k_p, C_IN, C_FEAT, NUM_CLASSES, DS)

    out = resnest_sed_forward(x, params, DS)
    out = jax.tree_util.tree_map(jax.block_until_ready, out)

    # light sanity checks on shapes / finiteness
    T = W // DS
    assert out["clipwise_output"].shape == (B, NUM_CLASSES)
    assert out["logit"].shape == (B, NUM_CLASSES)
    assert out["segmentwise_output"].shape == (B, T, NUM_CLASSES)
    assert out["framewise_output"].shape == (B, W, NUM_CLASSES)
    assert out["framewise_logit"].shape == (B, W, NUM_CLASSES)
    for v in out.values():
        assert bool(jnp.all(jnp.isfinite(v)))

    print("KERNEL_OK")
</pallas_src>

<mosaic_0001>
module attributes {stable_mosaic.version = 11 : i64} {
  func.func @_patch_matmul_kernel(%arg0: i32, %arg1: i32, %arg2: i32, %arg3: memref<32x256xbf16, #tpu.memory_space<vmem>>, %arg4: memref<256x128xbf16, #tpu.memory_space<vmem>>, %arg5: memref<1x128xf32, #tpu.memory_space<vmem>>, %arg6: memref<32x128xf32, #tpu.memory_space<vmem>>, %arg7: memref<32x128xf32, #tpu.memory_space<vmem>>) attributes {dimension_semantics = [#tpu.dimension_semantics<parallel>, #tpu.dimension_semantics<parallel>, #tpu.dimension_semantics<arbitrary>], iteration_bounds = array<i64: 1, 1, 1>, scalar_prefetch = 0 : i64, scratch_operands = 1 : i64, tpu.core_type = #tpu.core_type<tc>, window_params = [{transform_indices = @transform_0, window_bounds = array<i64: 32, 256>}, {transform_indices = @transform_1, window_bounds = array<i64: 256, 128>}, {transform_indices = @transform_2, window_bounds = array<i64: 1, 128>}, {transform_indices = @transform_3, window_bounds = array<i64: 32, 128>}]} {
    %c0_i32 = arith.constant 0 : i32
    %0 = arith.cmpi eq, %arg2, %c0_i32 : i32
    %1 = arith.extui %0 : i1 to i32
    %c0_i32_0 = arith.constant 0 : i32
    %2 = arith.cmpi ne, %1, %c0_i32_0 : i32
    scf.if %2 {
      %cst_10 = arith.constant 0.000000e+00 : f32
      %12 = vector.broadcast %cst_10 : f32 to vector<32x128xf32>
      %c0_11 = arith.constant 0 : index
      %c0_12 = arith.constant 0 : index
      %13 = vector.load %arg7[%c0_11, %c0_12] : memref<32x128xf32, #tpu.memory_space<vmem>>, vector<32x128xf32>
      tpu.vector_store %arg7[%c0_11, %c0_12], %12 {strides = array<i32>} : memref<32x128xf32, #tpu.memory_space<vmem>>, vector<32x128xf32>,
    } else {
    }
    %c0 = arith.constant 0 : index
    %c0_1 = arith.constant 0 : index
    %3 = vector.load %arg7[%c0, %c0_1] : memref<32x128xf32, #tpu.memory_space<vmem>>, vector<32x128xf32>
    %c0_2 = arith.constant 0 : index
    %c0_3 = arith.constant 0 : index
    %4 = vector.load %arg3[%c0_2, %c0_3] : memref<32x256xbf16, #tpu.memory_space<vmem>>, vector<32x256xbf16>
    %c0_4 = arith.constant 0 : index
    %c0_5 = arith.constant 0 : index
    %5 = vector.load %arg4[%c0_4, %c0_5] : memref<256x128xbf16, #tpu.memory_space<vmem>>, vector<256x128xbf16>
    %cst = arith.constant dense<0.000000e+00> : vector<32x128xf32>
    %6 = tpu.matmul %4, %5, %cst {dimension_numbers = #tpu.dot_dimension_numbers<[1], [0], [0], [1], [0, 0, 1, 1], [], []>} : vector<32x256xbf16>, vector<256x128xbf16>, vector<32x128xf32> -> vector<32x128xf32>
    %7 = arith.addf %3, %6 : vector<32x128xf32>
    %c0_6 = arith.constant 0 : index
    %c0_7 = arith.constant 0 : index
    %8 = vector.load %arg7[%c0_6, %c0_7] : memref<32x128xf32, #tpu.memory_space<vmem>>, vector<32x128xf32>
    tpu.vector_store %arg7[%c0_6, %c0_7], %7 {strides = array<i32>} : memref<32x128xf32, #tpu.memory_space<vmem>>, vector<32x128xf32>,
    %c0_i32_8 = arith.constant 0 : i32
    %9 = arith.cmpi eq, %arg2, %c0_i32_8 : i32
    %10 = arith.extui %9 : i1 to i32
    %c0_i32_9 = arith.constant 0 : i32
    %11 = arith.cmpi ne, %10, %c0_i32_9 : i32
    scf.if %11 {
      %c0_10 = arith.constant 0 : index
      %c0_11 = arith.constant 0 : index
      %12 = vector.load %arg7[%c0_10, %c0_11] : memref<32x128xf32, #tpu.memory_space<vmem>>, vector<32x128xf32>
      %c0_12 = arith.constant 0 : index
      %c0_13 = arith.constant 0 : index
      %13 = vector.load %arg5[%c0_12, %c0_13] : memref<1x128xf32, #tpu.memory_space<vmem>>, vector<1x128xf32>
      %14 = vector.broadcast %13 : vector<1x128xf32> to vector<32x128xf32>
      %15 = arith.addf %12, %14 : vector<32x128xf32>
      %cst_14 = arith.constant 0.000000e+00 : f32
      %16 = vector.broadcast %cst_14 : f32 to vector<32x128xf32>
      %17 = arith.maximumf %15, %16 : vector<32x128xf32>
      %c0_15 = arith.constant 0 : index
      %c0_16 = arith.constant 0 : index
      %18 = vector.load %arg6[%c0_15, %c0_16] : memref<32x128xf32, #tpu.memory_space<vmem>>, vector<32x128xf32>
      tpu.vector_store %arg6[%c0_15, %c0_16], %17 {strides = array<i32>} : memref<32x128xf32, #tpu.memory_space<vmem>>, vector<32x128xf32>,
    } else {
    }
    return
  }
  func.func @transform_0(%arg0: i32, %arg1: i32, %arg2: i32) -> (i32, i32) {
    %c0_i32 = arith.constant 0 : i32
    return %arg0, %arg2 : i32, i32
  }
  func.func @transform_1(%arg0: i32, %arg1: i32, %arg2: i32) -> (i32, i32) {
    %c0_i32 = arith.constant 0 : i32
    return %arg2, %arg1 : i32, i32
  }
  func.func @transform_2(%arg0: i32, %arg1: i32, %arg2: i32) -> (i32, i32) {
    %c0_i32 = arith.constant 0 : i32
    %c0_i32_0 = arith.constant 0 : i32
    return %c0_i32, %arg1 : i32, i32
  }
  func.func @transform_3(%arg0: i32, %arg1: i32, %arg2: i32) -> (i32, i32) {
    %c0_i32 = arith.constant 0 : i32
    return %arg0, %arg1 : i32, i32
  }
}

module attributes {stable_mosaic.version = 11 : i64} {
  func.func @_sed_head_kernel(%arg0: i32, %arg1: memref<1x2x8x32xf32, #tpu.memory_space<vmem>>, %arg2: memref<32x32xbf16, #tpu.memory_space<vmem>>, %arg3: memref<1x32xf32, #tpu.memory_space<vmem>>, %arg4: memref<32x256xbf16, #tpu.memory_space<vmem>>, %arg5: memref<1x256xf32, #tpu.memory_space<vmem>>, %arg6: memref<1x8x128xf32, #tpu.memory_space<vmem>>, %arg7: memref<1x8x128xf32, #tpu.memory_space<vmem>>, %arg8: memref<1x1x128xf32, #tpu.memory_space<vmem>>, %arg9: memref<1x1x128xf32, #tpu.memory_space<vmem>>) attributes {dimension_semantics = [#tpu.dimension_semantics<parallel>], iteration_bounds = array<i64: 2>, scalar_prefetch = 0 : i64, scratch_operands = 0 : i64, tpu.core_type = #tpu.core_type<tc>, window_params = [{transform_indices = @transform_0, window_bounds = array<i64: 1, 2, 8, 32>}, {pipeline_mode = #tpu.pipeline_mode<synchronous>, transform_indices = @transform_1, window_bounds = array<i64: 32, 32>}, {pipeline_mode = #tpu.pipeline_mode<synchronous>, transform_indices = @transform_2, window_bounds = array<i64: 1, 32>}, {pipeline_mode = #tpu.pipeline_mode<synchronous>, transform_indices = @transform_3, window_bounds = array<i64: 32, 256>}, {pipeline_mode = #tpu.pipeline_mode<synchronous>, transform_indices = @transform_4, window_bounds = array<i64: 1, 256>}, {transform_indices = @transform_5, window_bounds = array<i64: 1, 8, 128>}, {transform_indices = @transform_6, window_bounds = array<i64: 1, 8, 128>}, {transform_indices = @transform_7, window_bounds = array<i64: 1, 1, 128>}, {transform_indices = @transform_8, window_bounds = array<i64: 1, 1, 128>}]} {
    %c0 = arith.constant 0 : index
    %c0_0 = arith.constant 0 : index
    %c0_1 = arith.constant 0 : index
    %c0_2 = arith.constant 0 : index
    %0 = vector.load %arg1[%c0, %c0_0, %c0_1, %c0_2] : memref<1x2x8x32xf32, #tpu.memory_space<vmem>>, vector<1x2x8x32xf32>
    %1 = vector.shape_cast %0 : vector<1x2x8x32xf32> to vector<2x8x32xf32>
    %cst = arith.constant dense<0.000000e+00> : vector<8x32xf32>
    %2 = vector.multi_reduction <add>, %1, %cst [0] : vector<2x8x32xf32> to vector<8x32xf32>
    %cst_3 = arith.constant 2.000000e+00 : f32
    %3 = vector.broadcast %cst_3 : f32 to vector<8x32xf32>
    %4 = arith.divf %2, %3 : vector<8x32xf32>
    %cst_4 = arith.constant 0xFF800000 : f32
    %5 = vector.broadcast %cst_4 : f32 to vector<1x32xf32>
    %cst_5 = arith.constant 0.000000e+00 : f32
    %6 = vector.broadcast %cst_5 : f32 to vector<1x32xf32>
    %7 = vector.extract_strided_slice %4 {offsets = [0, 0], sizes = [7, 32], strides = [1, 1]} : vector<8x32xf32> to vector<7x32xf32>
    %8 = tpu.concatenate %5, %7 in 0 : vector<1x32xf32>, vector<7x32xf32> -> vector<8x32xf32>
    %9 = vector.extract_strided_slice %4 {offsets = [1, 0], sizes = [7, 32], strides = [1, 1]} : vector<8x32xf32> to vector<7x32xf32>
    %10 = tpu.concatenate %9, %5 in 0 : vector<7x32xf32>, vector<1x32xf32> -> vector<8x32xf32>
    %11 = arith.maximumf %8, %4 : vector<8x32xf32>
    %12 = arith.maximumf %11, %10 : vector<8x32xf32>
    %13 = vector.extract_strided_slice %4 {offsets = [0, 0], sizes = [7, 32], strides = [1, 1]} : vector<8x32xf32> to vector<7x32xf32>
    %14 = tpu.concatenate %6, %13 in 0 : vector<1x32xf32>, vector<7x32xf32> -> vector<8x32xf32>
    %15 = vector.extract_strided_slice %4 {offsets = [1, 0], sizes = [7, 32], strides = [1, 1]} : vector<8x32xf32> to vector<7x32xf32>
    %16 = tpu.concatenate %15, %6 in 0 : vector<7x32xf32>, vector<1x32xf32> -> vector<8x32xf32>
    %17 = arith.addf %14, %4 : vector<8x32xf32>
    %18 = arith.addf %17, %16 : vector<8x32xf32>
    %cst_6 = arith.constant 0.333333343 : f32
    %19 = vector.broadcast %cst_6 : f32 to vector<8x32xf32>
    %20 = arith.mulf %18, %19 : vector<8x32xf32>
    %21 = arith.addf %12, %20 : vector<8x32xf32>
    %22 = arith.truncf %21 : vector<8x32xf32> to vector<8x32xbf16>
    %c0_7 = arith.constant 0 : index
    %c0_8 = arith.constant 0 : index
    %23 = vector.load %arg2[%c0_7, %c0_8] : memref<32x32xbf16, #tpu.memory_space<vmem>>, vector<32x32xbf16>
    %cst_9 = arith.constant dense<0.000000e+00> : vector<8x32xf32>
    %24 = tpu.matmul %22, %23, %cst_9 {dimension_numbers = #tpu.dot_dimension_numbers<[1], [0], [0], [1], [0, 0, 1, 1], [], []>} : vector<8x32xbf16>, vector<32x32xbf16>, vector<8x32xf32> -> vector<8x32xf32>
    %c0_10 = arith.constant 0 : index
    %c0_11 = arith.constant 0 : index
    %25 = vector.load %arg3[%c0_10, %c0_11] : memref<1x32xf32, #tpu.memory_space<vmem>>, vector<1x32xf32>
    %26 = vector.broadcast %25 : vector<1x32xf32> to vector<8x32xf32>
    %27 = arith.addf %24, %26 : vector<8x32xf32>
    %cst_12 = arith.constant 0.000000e+00 : f32
    %28 = vector.broadcast %cst_12 : f32 to vector<8x32xf32>
    %29 = arith.maximumf %27, %28 : vector<8x32xf32>
    %30 = arith.truncf %29 : vector<8x32xf32> to vector<8x32xbf16>
    %c0_13 = arith.constant 0 : index
    %c0_14 = arith.constant 0 : index
    %31 = vector.load %arg4[%c0_13, %c0_14] : memref<32x256xbf16, #tpu.memory_space<vmem>>, vector<32x256xbf16>
    %cst_15 = arith.constant dense<0.000000e+00> : vector<8x256xf32>
    %32 = tpu.matmul %30, %31, %cst_15 {dimension_numbers = #tpu.dot_dimension_numbers<[1], [0], [0], [1], [0, 0, 1, 1], [], []>} : vector<8x32xbf16>, vector<32x256xbf16>, vector<8x256xf32> -> vector<8x256xf32>
    %c0_16 = arith.constant 0 : index
    %c0_17 = arith.constant 0 : index
    %33 = vector.load %arg5[%c0_16, %c0_17] : memref<1x256xf32, #tpu.memory_space<vmem>>, vector<1x256xf32>
    %34 = vector.broadcast %33 : vector<1x256xf32> to vector<8x256xf32>
    %35 = arith.addf %32, %34 : vector<8x256xf32>
    %36 = vector.extract_strided_slice %35 {offsets = [0, 0], sizes = [8, 128], strides = [1, 1]} : vector<8x256xf32> to vector<8x128xf32>
    %37 = vector.extract_strided_slice %35 {offsets = [0, 128], sizes = [8, 128], strides = [1, 1]} : vector<8x256xf32> to vector<8x128xf32>
    %38 = math.tanh %36 : vector<8x128xf32>
    %cst_18 = arith.constant dense<0xFF800000> : vector<128xf32>
    %39 = vector.multi_reduction <maximumf>, %38, %cst_18 [0] : vector<8x128xf32> to vector<128xf32>
    %40 = vector.shape_cast %39 : vector<128xf32> to vector<1x128xf32>
    %41 = vector.broadcast %40 : vector<1x128xf32> to vector<8x128xf32>
    %42 = arith.subf %38, %41 : vector<8x128xf32>
    %43 = math.exp %42 : vector<8x128xf32>
    %cst_19 = arith.constant dense<0.000000e+00> : vector<128xf32>
    %44 = vector.multi_reduction <add>, %43, %cst_19 [0] : vector<8x128xf32> to vector<128xf32>
    %45 = vector.shape_cast %44 : vector<128xf32> to vector<1x128xf32>
    %46 = tpu.reciprocal %45 {approx = true} : vector<1x128xf32> -> vector<1x128xf32>
    %47 = vector.broadcast %46 : vector<1x128xf32> to vector<8x128xf32>
    %48 = arith.mulf %43, %47 : vector<8x128xf32>
    %49 = arith.negf %37 : vector<8x128xf32>
    %50 = math.exp %49 : vector<8x128xf32>
    %cst_20 = arith.constant 1.000000e+00 : f32
    %51 = vector.broadcast %cst_20 : f32 to vector<8x128xf32>
    %52 = arith.addf %51, %50 : vector<8x128xf32>
    %53 = arith.divf %51, %52 : vector<8x128xf32>
    %c0_21 = arith.constant 0 : index
    %c0_22 = arith.constant 0 : index
    %c0_23 = arith.constant 0 : index
    %54 = vector.load %arg6[%c0_21, %c0_22, %c0_23] : memref<1x8x128xf32, #tpu.memory_space<vmem>>, vector<1x8x128xf32>
    %55 = vector.shape_cast %54 : vector<1x8x128xf32> to vector<8x128xf32>
    %56 = vector.shape_cast %53 : vector<8x128xf32> to vector<1x8x128xf32>
    tpu.vector_store %arg6[%c0_21, %c0_22, %c0_23], %56 {strides = array<i32>} : memref<1x8x128xf32, #tpu.memory_space<vmem>>, vector<1x8x128xf32>,
    %c0_24 = arith.constant 0 : index
    %c0_25 = arith.constant 0 : index
    %c0_26 = arith.constant 0 : index
    %57 = vector.load %arg7[%c0_24, %c0_25, %c0_26] : memref<1x8x128xf32, #tpu.memory_space<vmem>>, vector<1x8x128xf32>
    %58 = vector.shape_cast %57 : vector<1x8x128xf32> to vector<8x128xf32>
    %59 = vector.shape_cast %37 : vector<8x128xf32> to vector<1x8x128xf32>
    tpu.vector_store %arg7[%c0_24, %c0_25, %c0_26], %59 {strides = array<i32>} : memref<1x8x128xf32, #tpu.memory_space<vmem>>, vector<1x8x128xf32>,
    %60 = arith.mulf %48, %53 : vector<8x128xf32>
    %cst_27 = arith.constant dense<0.000000e+00> : vector<128xf32>
    %61 = vector.multi_reduction <add>, %60, %cst_27 [0] : vector<8x128xf32> to vector<128xf32>
    %62 = vector.shape_cast %61 : vector<128xf32> to vector<1x128xf32>
    %c0_28 = arith.constant 0 : index
    %c0_29 = arith.constant 0 : index
    %c0_30 = arith.constant 0 : index
    %63 = vector.load %arg8[%c0_28, %c0_29, %c0_30] : memref<1x1x128xf32, #tpu.memory_space<vmem>>, vector<1x1x128xf32>
    %64 = vector.shape_cast %63 : vector<1x1x128xf32> to vector<1x128xf32>
    %65 = vector.shape_cast %62 : vector<1x128xf32> to vector<1x1x128xf32>
    tpu.vector_store %arg8[%c0_28, %c0_29, %c0_30], %65 {strides = array<i32>} : memref<1x1x128xf32, #tpu.memory_space<vmem>>, vector<1x1x128xf32>,
    %66 = arith.mulf %48, %37 : vector<8x128xf32>
    %cst_31 = arith.constant dense<0.000000e+00> : vector<128xf32>
    %67 = vector.multi_reduction <add>, %66, %cst_31 [0] : vector<8x128xf32> to vector<128xf32>
    %68 = vector.shape_cast %67 : vector<128xf32> to vector<1x128xf32>
    %c0_32 = arith.constant 0 : index
    %c0_33 = arith.constant 0 : index
    %c0_34 = arith.constant 0 : index
    %69 = vector.load %arg9[%c0_32, %c0_33, %c0_34] : memref<1x1x128xf32, #tpu.memory_space<vmem>>, vector<1x1x128xf32>
    %70 = vector.shape_cast %69 : vector<1x1x128xf32> to vector<1x128xf32>
    %71 = vector.shape_cast %68 : vector<1x128xf32> to vector<1x1x128xf32>
    tpu.vector_store %arg9[%c0_32, %c0_33, %c0_34], %71 {strides = array<i32>} : memref<1x1x128xf32, #tpu.memory_space<vmem>>, vector<1x1x128xf32>,
    return
  }
  func.func @transform_0(%arg0: i32) -> (i32, i32, i32, i32) {
    %c0_i32 = arith.constant 0 : i32
    %c0_i32_0 = arith.constant 0 : i32
    %c0_i32_1 = arith.constant 0 : i32
    %c0_i32_2 = arith.constant 0 : i32
    return %arg0, %c0_i32, %c0_i32_0, %c0_i32_1 : i32, i32, i32, i32
  }
  func.func @transform_1(%arg0: i32) -> (i32, i32) {
    %c0_i32 = arith.constant 0 : i32
    %c0_i32_0 = arith.constant 0 : i32
    %c0_i32_1 = arith.constant 0 : i32
    return %c0_i32, %c0_i32_0 : i32, i32
  }
  func.func @transform_2(%arg0: i32) -> (i32, i32) {
    %c0_i32 = arith.constant 0 : i32
    %c0_i32_0 = arith.constant 0 : i32
    %c0_i32_1 = arith.constant 0 : i32
    return %c0_i32, %c0_i32_0 : i32, i32
  }
  func.func @transform_3(%arg0: i32) -> (i32, i32) {
    %c0_i32 = arith.constant 0 : i32
    %c0_i32_0 = arith.constant 0 : i32
    %c0_i32_1 = arith.constant 0 : i32
    return %c0_i32, %c0_i32_0 : i32, i32
  }
  func.func @transform_4(%arg0: i32) -> (i32, i32) {
    %c0_i32 = arith.constant 0 : i32
    %c0_i32_0 = arith.constant 0 : i32
    %c0_i32_1 = arith.constant 0 : i32
    return %c0_i32, %c0_i32_0 : i32, i32
  }
  func.func @transform_5(%arg0: i32) -> (i32, i32, i32) {
    %c0_i32 = arith.constant 0 : i32
    %c0_i32_0 = arith.constant 0 : i32
    %c0_i32_1 = arith.constant 0 : i32
    return %arg0, %c0_i32, %c0_i32_0 : i32, i32, i32
  }
  func.func @transform_6(%arg0: i32) -> (i32, i32, i32) {
    %c0_i32 = arith.constant 0 : i32
    %c0_i32_0 = arith.constant 0 : i32
    %c0_i32_1 = arith.constant 0 : i32
    return %arg0, %c0_i32, %c0_i32_0 : i32, i32, i32
  }
  func.func @transform_7(%arg0: i32) -> (i32, i32, i32) {
    %c0_i32 = arith.constant 0 : i32
    %c0_i32_0 = arith.constant 0 : i32
    %c0_i32_1 = arith.constant 0 : i32
    return %arg0, %c0_i32, %c0_i32_0 : i32, i32, i32
  }
  func.func @transform_8(%arg0: i32) -> (i32, i32, i32) {
    %c0_i32 = arith.constant 0 : i32
    %c0_i32_0 = arith.constant 0 : i32
    %c0_i32_1 = arith.constant 0 : i32
    return %arg0, %c0_i32, %c0_i32_0 : i32, i32, i32
  }
}

</mosaic_0001>

<bundles_post_ra>
// kernel: resnest_sed_forward.2
= control target key start
LH: loop header
LB: loop body
LE: loop exit
PB: predicated region body
PF: predicated region fallthrough
CT: control target
= control target key end

     0   :  { %s475_s1 = inlined_call_operand.vmem [shape: bf16[256,128], index: 1, kind: input, shape index: {}]   ;;  %s476_s0 = inlined_call_operand.vmem [shape: bf16[32,256], index: 0, kind: input, shape index: {}]   ;;  %s477_s2 = inlined_call_operand.vmem [shape: f32[1,128], index: 2, kind: input, shape index: {}]   ;;  %s478_s3 = inlined_call_operand.vmem [shape: f32[32,128], index: 3, kind: output, shape index: {}]  }
   0x1   :  { %v342_v0 = vld [vmem:[%s475_s1 + $0x38] sm:$0xff]  ;;  %v341_v2 = vld [vmem:[%s475_s1 + $0x30] sm:$0xff]  ;;  %v340_v4 = vld [vmem:[%s475_s1 + $0x28] sm:$0xff] }
   0x2   :  { %v350_v1 = vld [vmem:[%s475_s1 + $0x78] sm:$0xff]  ;;  %178 = vmatpush.bf16.msra.mxu0 %v342_v0  ;;  %351 = vmatpush.bf16.msra.mxu2 %v342_v0  ;;  %v349_v3 = vld [vmem:[%s475_s1 + $0x70] sm:$0xff]  ;;  %v348_v5 = vld [vmem:[%s475_s1 + $0x68] sm:$0xff] }
   0x3   :  { %197 = vmatpush.bf16.msra.mxu1 %v350_v1  ;;  %359 = vmatpush.bf16.msra.mxu3 %v350_v1  ;;  %v339_v6 = vld [vmem:[%s475_s1 + $0x20] sm:$0xff]  ;;  %v338_v8 = vld [vmem:[%s475_s1 + $0x18] sm:$0xff]  ;;  %v337_v10 = vld [vmem:[%s475_s1 + $0x10] sm:$0xff] }
   0x4   :  { %v347_v7 = vld [vmem:[%s475_s1 + $0x60] sm:$0xff]  ;;  %v346_v9 = vld [vmem:[%s475_s1 + $0x58] sm:$0xff]  ;;  %v345_v11 = vld [vmem:[%s475_s1 + $0x50] sm:$0xff] }
   0x5   :  { %v336_v12 = vld [vmem:[%s475_s1 + $0x8] sm:$0xff]  ;;  %v335_v14 = vld [vmem:[%s475_s1] sm:$0xff]  ;;  %v261_v18 = vld [vmem:[%s476_s0 + $0x10] sm:$0xf] }
   0x6   :  { %179 = vmatpush.bf16.msra.mxu0 %v341_v2  ;;  %352 = vmatpush.bf16.msra.mxu2 %v341_v2  ;;  %v344_v13 = vld [vmem:[%s475_s1 + $0x48] sm:$0xff]  ;;  %v343_v15 = vld [vmem:[%s475_s1 + $0x40] sm:$0xff]  ;;  %v334_v19 = vld [vmem:[%s476_s0 + $0x14] sm:$0xf0] }
   0x7   :  { %198 = vmatpush.bf16.msra.mxu1 %v349_v3  ;;  %360 = vmatpush.bf16.msra.mxu3 %v349_v3  ;;  %v253_v16 = vld [vmem:[%s476_s0] sm:$0xf]  ;;  %v332_v17 = vld [vmem:[%s476_s0 + $0x4] sm:$0xf0]  ;;  %v331_v20 = vld [vmem:[%s476_s0 + $0x4] sm:$0xf]  ;;  %v262_v25 = vor.u32 %v334_v19, %v261_v18 }
   0x8   :  { %v255_v21 = vld [vmem:[%s476_s0 + $0x8] sm:$0xf0]  ;;  %v333_v22 = vld [vmem:[%s476_s0 + $0x14] sm:$0xf]  ;;  %v263_v23 = vld [vmem:[%s476_s0 + $0x18] sm:$0xf0]  ;;  %v254_v24 = vor.u32 %v332_v17, %v253_v16 }
   0x9   :  { %v258_v26 = vor.u32 %v331_v20, %v255_v21  ;;  %v266_v27 = vor.u32 %v333_v22, %v263_v23  ;;  %v367_v29 = vld [vmem:[%s477_s2] ss:$0 sm:$0xff] }
   0xa   :  { %180 = vmatpush.bf16.msra.mxu0 %v340_v4  ;;  %353 = vmatpush.bf16.msra.mxu2 %v340_v4 }
   0xb   :  { %199 = vmatpush.bf16.msra.mxu1 %v348_v5  ;;  %361 = vmatpush.bf16.msra.mxu3 %v348_v5 }
   0xe   :  { %181 = vmatpush.bf16.msra.mxu0 %v339_v6  ;;  %354 = vmatpush.bf16.msra.mxu2 %v339_v6 }
   0xf   :  { %200 = vmatpush.bf16.msra.mxu1 %v347_v7  ;;  %362 = vmatpush.bf16.msra.mxu3 %v347_v7 }
  0x12   :  { %182 = vmatpush.bf16.msra.mxu0 %v338_v8  ;;  %355 = vmatpush.bf16.msra.mxu2 %v338_v8 }
  0x13   :  { %201 = vmatpush.bf16.msra.mxu1 %v346_v9  ;;  %363 = vmatpush.bf16.msra.mxu3 %v346_v9 }
  0x16   :  { %183 = vmatpush.bf16.msra.mxu0 %v337_v10  ;;  %356 = vmatpush.bf16.msra.mxu2 %v337_v10 }
  0x17   :  { %202 = vmatpush.bf16.msra.mxu1 %v345_v11  ;;  %364 = vmatpush.bf16.msra.mxu3 %v345_v11 }
  0x1a   :  { %184 = vmatpush.bf16.msra.mxu0 %v336_v12  ;;  %357 = vmatpush.bf16.msra.mxu2 %v336_v12 }
  0x1b   :  { %203 = vmatpush.bf16.msra.mxu1 %v344_v13  ;;  %365 = vmatpush.bf16.msra.mxu3 %v344_v13 }
  0x1e   :  { %185 = vmatpush.bf16.msra.mxu0 %v335_v14  ;;  %358 = vmatpush.bf16.msra.mxu2 %v335_v14 }
  0x1f   :  { %204 = vmatpush.bf16.msra.mxu1 %v343_v15  ;;  %366 = vmatpush.bf16.msra.mxu3 %v343_v15 }
  0x21   :  { %186 = vmatmul.bf16.vlgmr.msra.gmra.mxu0 %v254_v24  ;;  %191 = vmatmul.bf16.vlgmr.msra.gmra.mxu2 %v262_v25 }
  0x22   :  { %205 = vmatmul.bf16.vlgmr.msra.gmra.mxu1 %v258_v26  ;;  %210 = vmatmul.bf16.vlgmr.msra.gmra.mxu3 %v266_v27 }
  0x9e   :  { %v187_v28 = vpop.f32.mrf.mxu0 }
  0x9f   :  { %v206_v30 = vpop.f32.mrf.mxu1 }
  0xa0   :  { %v207_v31 = vadd.f32 %v206_v30, %v187_v28 }
  0xa2   :  { %v235_v32 = vadd.f32 %v367_v29, %v207_v31 }
  0xa4   :  { %v239_v33 = vmax.f32 %v235_v32, 0.0  ;;  %v192_v34 = vpop.f32.mrf.mxu2 }
  0xa5   :  { %v211_v35 = vpop.f32.mrf.mxu3 }
  0xa6   :  { %243 = vst [vmem:[%s478_s3] sm:$0xff] %v239_v33  ;;  %v212_v36 = vadd.f32 %v211_v35, %v192_v34  ;;  %v189_v37 = vpop.f32.mrf.mxu0 }
  0xa7   :  { %v208_v38 = vpop.f32.mrf.mxu1 }
  0xa8   :  { %v237_v39 = vadd.f32 %v367_v29, %v212_v36  ;;  %v209_v40 = vadd.f32 %v208_v38, %v189_v37 }
  0xaa   :  { %v241_v41 = vmax.f32 %v237_v39, 0.0  ;;  %v236_v42 = vadd.f32 %v367_v29, %v209_v40 }
  0xac   :  { %245 = vst [vmem:[%s478_s3 + $0x10] sm:$0xff] %v241_v41  ;;  %v240_v43 = vmax.f32 %v236_v42, 0.0  ;;  %v194_v44 = vpop.f32.mrf.mxu2 }
  0xad   :  { %v213_v45 = vpop.f32.mrf.mxu3 }
  0xae   :  { %244 = vst [vmem:[%s478_s3 + $0x8] sm:$0xff] %v240_v43  ;;  %v214_v46 = vadd.f32 %v213_v45, %v194_v44 }
  0xb0   :  { %v238_v47 = vadd.f32 %v367_v29, %v214_v46 }
  0xb2   :  { %v242_v48 = vmax.f32 %v238_v47, 0.0 }
  0xb4   :  { %246 = vst [vmem:[%s478_s3 + $0x18] sm:$0xff] %v242_v48 }

// kernel: resnest_sed_forward.3
= control target key start
LH: loop header
LB: loop body
LE: loop exit
PB: predicated region body
PF: predicated region fallthrough
CT: control target
= control target key end

     0   :  { %s1113_s0 = inlined_call_operand.vmem [shape: f32[2,2,8,32], index: 0, kind: input, shape index: {}]   ;;  %s1114_s1 = inlined_call_operand.vmem [shape: bf16[32,32], index: 1, kind: input, shape index: {}]   ;;  %s1115_s2 = inlined_call_operand.vmem [shape: f32[1,32], index: 2, kind: input, shape index: {}]   ;;  %s1116_s3 = inlined_call_operand.vmem [shape: bf16[32,256], index: 3, kind: input, shape index: {}]   ;;  %s1117_s4 = inlined_call_operand.vmem [shape: f32[1,256], index: 4, kind: input, shape index: {}]   ;;  %s1118_s5 = inlined_call_operand.vmem [shape: f32[2,8,128], index: 5, kind: output, shape index: {0}]   ;;  %s1119_s6 = inlined_call_operand.vmem [shape: f32[2,8,128], index: 6, kind: output, shape index: {1}]   ;;  %s1120_s7 = inlined_call_operand.hbm [shape: f32[2,1,128], index: 7, kind: output, shape index: {2}]   ;;  %s1121_s8 = inlined_call_operand.hbm [shape: f32[2,1,128], index: 8, kind: output, shape index: {3}]  }
   0x1   :  { %1123 = sst [smem:[#allocation9_spill]] %s1113_s0 }
   0x2   :  { %14 = vsyncpa [#allocation3], 0 }
   0x3   :  { %16 = vsyncpa [#allocation3 + $0x1], 0 }
   0x4   :  { %17 = vsyncpa [#allocation5], 0 }
   0x5   :  { %19 = vsyncpa [#allocation5 + $0x1], 0  ;;  %s938_s27 = smov 0   ;;  %s940_s28 = smov 0  }
   0x6   :  { %s942_s29 = smov 0   ;;  %s944_s30 = smov 0  }
   0x7 LB: > { %s959_s9 = sadd.s32 4294967295, %s890_s30   ;;  %s693_s10 = sadd.s32 4294967294, %s890_s30   ;;  %s890_s30 = sphi %s944_s30, %s1133_s30   ;;  %s886_s29 = sphi %s942_s29, %s1132_s29   ;;  %s882_s28 = sphi %s940_s28, %s1131_s28   ;;  %s878_s27 = sphi %s938_s27, %s1130_s27  }
   0x8   : > { %s963_s11 = sadd.s32 1, %s890_s30   ;;  %s194_s12 = sadd.s32 1, %s886_s29 }
   0x9   : > { %s191_s13 = ssub.s32 %s890_s30, %s963_s11  ;;  %p204_p0 = scmp.ne.s32.totalorder %s886_s29, %s882_s28 }
   0xa   : > { %p192_p1 = scmp.eq.s32.totalorder %s191_s13, 0  ;;  %p205_p2 = scmp.eq.s32.totalorder %s959_s9, 1 }
   0xb   : > { %p210_p3 = scmp.ne.s32.totalorder %s882_s28, %s878_s27  ;;  %p211_p4 = scmp.eq.s32.totalorder %s693_s10, 1 }
   0xc   : > { %s974_s14 = scalar_select %p192_p1, %s886_s29, %s194_s12  }
   0xd   : > { %p976_p5 = por %p205_p2, %p204_p0  ;;  %p980_p6 = por %p211_p4, %p210_p3 }
   0xe   : > { %p696_p7 = scmp.ge.s32.totalorder %s890_s30, 1  ;;  %p275_p8 = scmp.lt.s32.totalorder %s890_s30, 3 }
  0x10   : > { %p276_p9 = pnand %p696_p7, %p275_p8 }
  0x12   : > { %279 = sbr.rel (%p276_p9) target bundleno = 402 (0x192), region = 40 }
  0x17   : > { %v733_v0 = vld [vmem:[%s1114_s1 + $0x8] sm:$0xff]  ;;  %p320_p10 = scmp.lt.s32.totalorder %s959_s9, 1  ;;  %v892_v1 = vmov 2.0   ;;  %v732_v2 = vld [vmem:[%s1114_s1] sm:$0xff]  ;;  %s1126_s0 = sld [smem:[#allocation9_spill]]  ;;  %vm336_vm0 = vcmask 261120  }
  0x18   : > { %784 = vrcp.f32 %v892_v1  ;;  %395 = vmatpush.bf16.msra.mxu0 %v733_v0  ;;  %vm351_vm2 = vcmask 1040384   ;;  %vm355_vm3 = vcmask 1046528   ;;  %v720_v28 = vld [vmem:[%s1116_s3 + $0x10] sm:$0xf]  ;;  %v737_v29 = vld [vmem:[%s1116_s3 + $0x14] sm:$0xf0]  ;;  %s545_s18 = scalar_lea.hbm %s1120_s7, %s959_s9 }
  0x19   : > { %s994_s21 = scalar_select %p320_p10, %s959_s9, 1  ;;  %v736_v30 = vld [vmem:[%s1116_s3 + $0x14] sm:$0xf]  ;;  %v721_v31 = vor.u32 %v737_v29, %v720_v28  ;;  %v722_v32 = vld [vmem:[%s1116_s3 + $0x18] sm:$0xf0] }
  0x1a   : > { %v725_v33 = vor.u32 %v736_v30, %v722_v32  ;;  %v712_v34 = vld [vmem:[%s1116_s3] sm:$0xf]  ;;  %v735_v35 = vld [vmem:[%s1116_s3 + $0x4] sm:$0xf0]  ;;  %v734_v36 = vld [vmem:[%s1116_s3 + $0x4] sm:$0xf] }
  0x1b   : > { %s731_s22 = sshll.u32 %s994_s21, 4  ;;  %443 = vmatpush.bf16.msra.mxu1 %v721_v31  ;;  %v713_v37 = vor.u32 %v735_v35, %v712_v34  ;;  %v714_v38 = vld [vmem:[%s1116_s3 + $0x8] sm:$0xf0]  ;;  %v783_v40 = vld [vmem:[%s1115_s2] ss:$0 sm:$0xff]  ;;  %s816_s20 = scalar_lea.hbm %s1120_s7, 2 }
  0x1c   : > { %396 = vmatpush.bf16.msra.mxu0 %v732_v2  ;;  %456 = vmatpush.bf16.msra.mxu2 %v725_v33  ;;  %v717_v39 = vor.u32 %v734_v36, %v714_v38  ;;  %v408_v46 = vld [vmem:[%s1117_s4] sm:$0x3] }
  0x1d   : > { %s324_s25 = scalar_lea.vmem %s1126_s0, %s731_s22  ;;  %v410_v47 = vperm.slane %v408_v46, 0  ;;  %s699_s22 = sshll.u32 %s994_s21, 3  ;;  %v411_v50 = vperm.slane %v408_v46, 1 }
  0x1e   : > { %v785_v3 = vpop.eup %784  ;;  %v334_v4 = vld [vmem:[%s324_s25] sm:$0xff]  ;;  %v335_v5 = vld [vmem:[%s324_s25 + $0x8] sm:$0xff]  ;;  %s332_s25 = scalar_lea.vmem %s1119_s6, %s699_s22  ;;  %s328_s12 = scalar_lea.vmem %s1118_s5, %s699_s22 }
  0x1f   : > { %v341_v6 = vmul.f32 2.0, %v785_v3  ;;  %v337_v7 = vsel %vm336_vm0, %v334_v4, 0.0  ;;  %v338_v8 = vsel %vm336_vm0, %v335_v5, 0.0  ;;  %vm345_vm1 = vweird.f32 %v785_v3  ;;  %444 = vmatpush.bf16.msra.mxu1 %v713_v37  ;;  %s1047_s21 = sand.u32 1, %s882_s28   ;;  %s558_s22 = scalar_lea.hbm %s1121_s8, %s959_s9 }
  0x20   : > { %v339_v11 = vadd.f32 %v338_v8, %v337_v7  ;;  %457 = vmatpush.bf16.msra.mxu2 %v717_v39  ;;  %s313_s23 = scalar_lea.vmem [#allocation2], %s1047_s21  ;;  %s319_s26 = scalar_lea.vmem [#allocation4], %s1047_s21 }
  0x21   : > { %v342_v9 = vsub.f32 1.0, %v341_v6  ;;  %s1058_s24 = sshll.u32 %s313_s23, 4  ;;  %s1061_s10 = sshll.u32 %s319_s26, 4  ;;  %s548_s24 = int_to_ptr.vmem [resolvable:$true] %s1058_s24 }
  0x22   : > { %1127 = sst [smem:[#allocation8_spill]] %s1061_s10  ;;  %s527_s9 = scalar_lea.sflag [#allocation3], %s1047_s21 }
  0x23   : > { %v343_v10 = vmul.f32 %v785_v3, %v342_v9 }
  0x25   : > { %v344_v12 = vadd.f32 %v785_v3, %v343_v10 }
  0x27   : > { %v346_v13 = vsel %vm345_vm1, %v785_v3, %v344_v12 }
  0x28   : > { %v347_v14 = vmul.f32 %v346_v13, %v339_v11 }
  0x2a   : > { %v349_v15 = vrot.slane %v347_v14, 7  ;;  %v353_v16 = vrot.slane %v347_v14, 1 }
  0x2c   : > { %v352_v17 = vsel %vm351_vm2, -inf, %v349_v15  ;;  %v356_v18 = vsel %vm355_vm3, %v353_v16, -inf  ;;  %v359_v19 = vsel %vm351_vm2, 0.0, %v349_v15  ;;  %v360_v20 = vsel %vm355_vm3, %v353_v16, 0.0 }
  0x2d   : > { %v357_v21 = vmax.f32 %v352_v17, %v347_v14  ;;  %v361_v22 = vadd.f32 %v359_v19, %v347_v14 }
  0x2f   : > { %v358_v23 = vmax.f32 %v357_v21, %v356_v18  ;;  %v362_v24 = vadd.f32 %v361_v22, %v360_v20 }
  0x31   : > { %v363_v25 = vmul.f32 0.33333334, %v362_v24 }
  0x33   : > { %v364_v26 = vadd.f32 %v363_v25, %v358_v23 }
  0x35   : > { %v365_v27 = vpack.c.bf16 %v364_v26, %v364_v26 }
  0x37   : > { %709 = vmatmul.msk.bf16.vlgmr.msra.gmra.mxu0 %vm336_vm0, %v365_v27 }
  0xb4   : > { %v398_v41 = vpop.f32.mrf.mxu0 }
  0xb5   : > { %v399_v42 = vadd.f32 %v783_v40, %v398_v41 }
  0xb7   : > { %v402_v43 = vmax.f32 %v399_v42, 0.0 }
  0xb9   : > { %v403_v44 = vpack.c.bf16 %v402_v43, %v402_v43 }
  0xbb   : > { %726 = vmatmul.msk.bf16.vlgmr.msra.gmra.mxu1 %vm336_vm0, %v403_v44  ;;  %727 = vmatmul.msk.bf16.vlgmr.msra.gmra.mxu2 %vm336_vm0, %v403_v44 }
  0xbc   : > { %v400_v45 = vpop.f32.mrf.mxu0 }
 0x138   : > { %v446_v48 = vpop.f32.mrf.mxu1 }
 0x139   : > { %v447_v49 = vadd.f32 %v446_v48, %v410_v47 }
 0x13b   : > { %786 = vtanh.f32 %v447_v49 }
 0x13e   : > { %v459_v51 = vpop.f32.mrf.mxu2 }
 0x13f   : > { %v460_v52 = vadd.f32 %v459_v51, %v411_v50 }
 0x140   : > { %v448_v53 = vpop.f32.mrf.mxu1 }
 0x141   : > { %v787_v54 = vpop.eup %786  ;;  %v728_v55 = vmul.f32 -1.442695, %v460_v52  ;;  %501 = vst [vmem:[%s332_s25] sm:$0xff] %v460_v52  ;;  %s549_s25 = sshll.u32 %s545_s18, 4  ;;  %s550_s25 = int_to_ptr.hbm [resolvable:$true] %s549_s25 }
 0x142   : > { %v464_v56 = vrot.slane %v787_v54, 4  ;;  %s810_s13 = sshra.s32 %s550_s25, 4  ;;  %s811_s13 = int_to_ptr.hbm [resolvable:$true] %s810_s13 }
 0x143   : > { %788 = vpow2.f32 %v728_v55  ;;  %s812_s17 = scalar_lea.hbm %s811_s13, 1  ;;  %p817_p0 = scmp.lt.s32.totalorder %s811_s13, %s1120_s7 }
 0x144   : > { %v465_v57 = vmax.f32 %v787_v54, %v464_v56  ;;  %p813_p11 = scmp.ne.s32.totalorder %s811_s13, %s812_s17  ;;  %p818_p1 = scmp.lt.s32.totalorder %s816_s20, %s812_s17 }
 0x146   : > { %v466_v58 = vrot.slane %v465_v57, 2  ;;  %v461_v59 = vpop.f32.mrf.mxu2  ;;  %p814_p12 = pnand %p813_p11, %p976_p5  ;;  %p819_p2 = por %p818_p1, %p817_p0 }
 0x148   : > { %v467_v60 = vmax.f32 %v465_v57, %v466_v58  ;;  %p815_p13 = pneg %p814_p12 }
 0x149   : > { %v789_v61 = vpop.eup %788 }
 0x14a   : > { %v468_v62 = vrot.slane %v467_v60, 1  ;;  %v484_v63 = vadd.f32 1.0, %v789_v61  ;;  %p820_p3 = pnand %p819_p2, %p815_p13 }
 0x14c   : > { %v469_v0 = vmax.f32 %v467_v60, %v468_v62  ;;  %790 = vrcp.f32 %v484_v63  ;;  %v496_v6 = vand.u32 2147483648, %v484_v63  ;;  %v494_v8 = vand.u32 2147483647, %v484_v63 }
 0x14d   : > { %vm490_vm5 = vweird.f32 %v484_v63 }
 0x14e   : > { %v470_v1 = vsub.f32 %v787_v54, %v469_v0  ;;  %v497_v12 = vor.u32 1.1754944e-38, %v496_v6  ;;  %vm495_vm7 = vcmp.eq.f32.partialorder %v494_v8, 8.507059e+37 }
 0x150   : > { %v471_v2 = vmul.f32 1.442695, %v470_v1 }
 0x152   : > { %v791_v3 = vpop.eup %790  ;;  %792 = vpow2.f32 %v471_v2 }
 0x153   : > { %v486_v4 = vmul.f32 %v791_v3, %v484_v63  ;;  %vm491_vm4 = vweird.f32 %v791_v3 }
 0x154   : > { %vm492_vm6 = vmor %vm490_vm5, %vm491_vm4 }
 0x155   : > { %v487_v5 = vsub.f32 1.0, %v486_v4 }
 0x157   : > { %v488_v7 = vmul.f32 %v791_v3, %v487_v5 }
 0x158   : > { %v793_v9 = vpop.eup %792 }
 0x159   : > { %v473_v10 = vrot.slane %v793_v9, 4  ;;  %v489_v11 = vadd.f32 %v791_v3, %v488_v7 }
 0x15b   : > { %v474_v13 = vadd.f32 %v793_v9, %v473_v10  ;;  %v493_v14 = vsel %vm492_vm6, %v791_v3, %v489_v11 }
 0x15c   : > { %v498_v15 = vsel %vm495_vm7, %v497_v12, %v493_v14 }
 0x15d   : > { %v475_v16 = vrot.slane %v474_v13, 2  ;;  %500 = vst [vmem:[%s328_s12] sm:$0xff] %v498_v15  ;;  %s1063_s12 = sshll.u32 %s558_s22, 4  ;;  %s563_s12 = int_to_ptr.hbm [resolvable:$true] %s1063_s12 }
 0x15f   : > { %v476_v17 = vadd.f32 %v475_v16, %v474_v13 }
 0x161   : > { %v477_v18 = vrot.slane %v476_v17, 1 }
 0x163   : > { %v478_v19 = vadd.f32 %v477_v18, %v476_v17 }
 0x165   : > { %794 = vrcp.f32 %v478_v19 }
 0x16b   : > { %v795_v20 = vpop.eup %794 }
 0x16c   : > { %v480_v21 = vmul.f32 %v795_v20, %v793_v9 }
 0x16e   : > { %v502_v22 = vmul.f32 %v498_v15, %v480_v21  ;;  %v510_v23 = vmul.f32 %v480_v21, %v460_v52 }
 0x170   : > { %v503_v24 = vrot.slane %v502_v22, 4  ;;  %v511_v25 = vrot.slane %v510_v23, 4 }
 0x172   : > { %v512_v26 = vadd.f32 %v511_v25, %v510_v23  ;;  %v504_v27 = vadd.f32 %v503_v24, %v502_v22 }
 0x174   : > { %v513_v28 = vrot.slane %v512_v26, 2  ;;  %v505_v29 = vrot.slane %v504_v27, 2 }
 0x176   : > { %v506_v30 = vadd.f32 %v505_v29, %v504_v27  ;;  %v514_v31 = vadd.f32 %v513_v28, %v512_v26 }
 0x178   : > { %v507_v32 = vrot.slane %v506_v30, 1  ;;  %v515_v33 = vrot.slane %v514_v31, 1 }
 0x17a   : > { %v508_v34 = vadd.f32 %v507_v32, %v506_v30  ;;  %v516_v35 = vadd.f32 %v515_v33, %v514_v31 }
 0x17c   : > { %509 = vst [vmem:[%s313_s23] sm:$0x1] %v508_v34 }
 0x17d   : > { %823 = shalt.err (!%p820_p3)
}
 0x17e   : > { %738 = dma.vmem_to_hbm [thread:$0]  (%p976_p5), %s548_s24, 16, %s550_s25, %s527_s9   ;;  %517 = vst [vmem:[%s319_s26] sm:$0x1] %v516_v35 }
 0x17f   : > { %s531_s23 = scalar_lea.sflag [#allocation5], %s1047_s21  ;;  %s838_s10 = sshra.s32 %s563_s12, 4  ;;  %s839_s10 = int_to_ptr.hbm [resolvable:$true] %s838_s10 }
 0x180   : > { %s840_s18 = scalar_lea.hbm %s839_s10, 1  ;;  %s844_s17 = scalar_lea.hbm %s1121_s8, 2 }
 0x181   : > { %p841_p4 = scmp.ne.s32.totalorder %s839_s10, %s840_s18  ;;  %p845_p9 = scmp.lt.s32.totalorder %s839_s10, %s1121_s8 }
 0x182   : > { %p846_p10 = scmp.lt.s32.totalorder %s844_s17, %s840_s18 }
 0x183   : > { %p842_p7 = pnand %p841_p4, %p976_p5 }
 0x184   : > { %p847_p11 = por %p846_p10, %p845_p9 }
 0x185   : > { %p843_p8 = pneg %p842_p7 }
 0x187   : > { %p848_p12 = pnand %p847_p11, %p843_p8 }
 0x189   : > { %851 = shalt.err (!%p848_p12)
}
 0x18a   : > { %s1128_s21 = sld [smem:[#allocation8_spill]] }
 0x190   : > { %s1129_s24 = int_to_ptr.vmem [resolvable:$true] %s1128_s21 }
 0x191   : > { %739 = dma.vmem_to_hbm [thread:$0]  (%p976_p5), %s1129_s24, 16, %s563_s12, %s531_s23  }
 0x192 PF: > { %p749_p13 = scmp.ge.s32.totalorder %s890_s30, 2  ;;  %s588_s25 = sand.u32 1, %s878_s27  }
 0x193   : > { %s589_s26 = scalar_lea.sflag [#allocation3], %s588_s25 }
 0x194   : > { %p743_p0 = pnand %p749_p13, %p980_p6 }
 0x196   : > { %p744_p1 = pneg %p743_p0 }
 0x198   : > { %869 = dma.done.wait (%p744_p1), %s589_s26, 16  }
 0x199   : > { %871 = vsyncadd (%p744_p1), %s589_s26, 4294967280  ;;  %s598_s10 = scalar_lea.sflag [#allocation5], %s588_s25 }
 0x19a   : > { %873 = dma.done.wait (%p744_p1), %s598_s10, 16  }
 0x19b   : > { %875 = vsyncadd (%p744_p1), %s598_s10, 4294967280  ;;  %p22_p5 = scmp.ge.s32.totalorder %s963_s11, 4   ;;  %s1130_s27 = smov %s882_s28 }
 0x19c   : > { %s1131_s28 = smov %s886_s29  ;;  %s1132_s29 = smov %s974_s14 }
 0x19d   : > { %s1133_s30 = smov %s963_s11  ;;  %24 = sbr.rel (!%p22_p5) target bundleno = 7 (0x7), region = 116 }
 0x1a2   :  { %603 = vsyncpa [#allocation3], 1 }
 0x1a3   :  { %605 = vsyncpa [#allocation3 + $0x1], 1 }
 0x1a4   :  { %606 = vsyncpa [#allocation5], 1 }
 0x1a5   :  { %608 = vsyncpa [#allocation5 + $0x1], 1 }

</bundles_post_ra>
